<compile_context>
chip_gen: v5e
topology: v5e:2x2
jax: 0.10.0
libtpu: 0.0.40
codegen_flags: <defaults>
</compile_context>

<pallas_src>
import jax
import jax.numpy as jnp
from jax.experimental import pallas as pl
from jax.experimental.pallas import tpu as pltpu


def ssm_kernel(x_ref, u_ref, wa_ref, wb_ref, o_ref):
    # x_ref : (tb, So*Sd)   activation tile (state history, orders flattened)
    # u_ref : (tb, Ao*Ad)   activation tile (action history, orders flattened)
    # wa_ref: (So*Sd, Sd)   pre-exp'd, pre-transposed, stacked A weights (resident)
    # wb_ref: (Ao*Ad, Sd)   pre-exp'd, pre-transposed, stacked B weights (resident)
    # o_ref : (tb, Sd)
    acc = jnp.dot(x_ref[...], wa_ref[...], preferred_element_type=jnp.float32)
    acc = acc + jnp.dot(u_ref[...], wb_ref[...], preferred_element_type=jnp.float32)
    o_ref[...] = acc.astype(o_ref.dtype)


def _round_up(n, m):
    return ((n + m - 1) // m) * m


def reparam_multi_linear_ssm(x, u, wa_raw, wb_raw, *, block_b=4096,
                             compute_dtype=jnp.bfloat16, out_dtype=None):
    """Forward pass of ReparamMultiLinearSSM.

    x      : (B, state_order, state_dim)
    u      : (B, action_order, action_dim)
    wa_raw : (state_order, state_dim, state_dim)   raw weights, nn.Linear (out, in)
    wb_raw : (action_order, state_dim, action_dim) raw weights, nn.Linear (out, in)
    returns (B, state_dim) in out_dtype (defaults to x.dtype)
    """
    B = x.shape[0]
    state_order, state_dim, _ = wa_raw.shape
    action_order, _, action_dim = wb_raw.shape
    kx = state_order * state_dim
    ku = action_order * action_dim
    out_dtype = out_dtype or x.dtype

    # --- weight prep (once, outside the kernel; XLA, not on the hot path) ---
    # exp reparameterization in f32, lay out each order's weight as (in, out),
    # stack all orders along the contraction dim, then cast to compute dtype.
    wa = jnp.transpose(jnp.exp(wa_raw.astype(jnp.float32)), (0, 2, 1))
    wb = jnp.transpose(jnp.exp(wb_raw.astype(jnp.float32)), (0, 2, 1))
    wa = wa.reshape(kx, state_dim).astype(compute_dtype)
    wb = wb.reshape(ku, state_dim).astype(compute_dtype)

    # --- activation prep: flatten orders into the contraction dims (no concat,
    #     no pad; reshape is layout-preserving, cast halves the HBM bytes) ----
    x2d = x.reshape(B, kx).astype(compute_dtype)
    u2d = u.reshape(B, ku).astype(compute_dtype)

    # --- batch tile: big enough to amortize per-step overhead, but >=2 blocks
    #     so v7x's two TensorCores both get work; always a multiple of 8 ------
    block_b = max(8, _round_up(block_b, 8))
    tb = min(block_b, max(8, _round_up(pl.cdiv(B, 2), 8)))
    n_blocks = pl.cdiv(B, tb)

    in_bytes = jnp.dtype(compute_dtype).itemsize
    out_bytes = jnp.dtype(out_dtype).itemsize
    cost = pl.CostEstimate(
        flops=2 * B * (kx + ku) * state_dim,
        transcendentals=0,
        bytes_accessed=(B * (kx + ku) * in_bytes
                        + (kx + ku) * state_dim * in_bytes
                        + B * state_dim * out_bytes),
    )

    out = pl.pallas_call(
        ssm_kernel,
        out_shape=jax.ShapeDtypeStruct((B, state_dim), out_dtype),
        grid=(n_blocks,),
        in_specs=[
            pl.BlockSpec((tb, kx), lambda i: (i, 0)),          # x tile: over B
            pl.BlockSpec((tb, ku), lambda i: (i, 0)),          # u tile: over B
            pl.BlockSpec((kx, state_dim), lambda i: (0, 0)),   # Wa: resident
            pl.BlockSpec((ku, state_dim), lambda i: (0, 0)),   # Wb: resident
        ],
        out_specs=pl.BlockSpec((tb, state_dim), lambda i: (i, 0)),
        compiler_params=pltpu.CompilerParams(
            dimension_semantics=("parallel",),
            vmem_limit_bytes=32 * 1024 * 1024,
        ),
        cost_estimate=cost,
    )(x2d, u2d, wa, wb)

    return out


def reference(x, u, wa_raw, wb_raw):
    # Pure-JAX f32 reference mirroring the PyTorch forward.
    res = 0.0
    for i in range(wa_raw.shape[0]):
        res = res + x[:, i, :] @ jnp.exp(wa_raw[i]).T
    for j in range(wb_raw.shape[0]):
        res = res + u[:, j, :] @ jnp.exp(wb_raw[j]).T
    return res


if __name__ == "__main__":
    state_dim = 32
    action_dim = 16
    state_order = 3
    action_order = 2

    key = jax.random.PRNGKey(0)
    kx, ku, ka, kb, kx2, ku2 = jax.random.split(key, 6)

    # Raw (pre-exp) weights, nn.Linear layout (out_dim, in_dim) per order.
    wa_raw = 0.1 * jax.random.normal(
        ka, (state_order, state_dim, state_dim), dtype=jnp.float32)
    wb_raw = 0.1 * jax.random.normal(
        kb, (action_order, state_dim, action_dim), dtype=jnp.float32)

    # --- small batch from the module spec ------------------------------------
    B = 4
    x = jax.random.normal(kx, (B, state_order, state_dim), dtype=jnp.float32)
    u = jax.random.normal(ku, (B, action_order, action_dim), dtype=jnp.float32)
    ref = reference(x, u, wa_raw, wb_raw)

    # f32 compute path: tight semantic check against the reference.
    out_f32 = jax.block_until_ready(
        reparam_multi_linear_ssm(x, u, wa_raw, wb_raw, compute_dtype=jnp.float32))
    assert out_f32.shape == (B, state_dim)
    assert jnp.allclose(out_f32, ref, atol=1e-4, rtol=1e-4), "f32 mismatch (B=4)"

    # bf16 compute path (default, MXU-native): loosened tolerance, f32 accumulation.
    out_bf16 = jax.block_until_ready(
        reparam_multi_linear_ssm(x, u, wa_raw, wb_raw))
    assert out_bf16.shape == (B, state_dim)
    assert jnp.allclose(out_bf16, ref, atol=2e-1, rtol=2e-2), "bf16 mismatch (B=4)"

    # --- larger batch exercising a multi-block grid + a partial last block ---
    B2 = 50
    x2 = jax.random.normal(kx2, (B2, state_order, state_dim), dtype=jnp.float32)
    u2 = jax.random.normal(ku2, (B2, action_order, action_dim), dtype=jnp.float32)
    ref2 = reference(x2, u2, wa_raw, wb_raw)

    out2 = jax.block_until_ready(
        reparam_multi_linear_ssm(x2, u2, wa_raw, wb_raw,
                                 block_b=16, compute_dtype=jnp.float32))
    assert out2.shape == (B2, state_dim)
    assert jnp.allclose(out2, ref2, atol=1e-4, rtol=1e-4), "f32 mismatch (B=50)"

    out2_bf16 = jax.block_until_ready(
        reparam_multi_linear_ssm(x2, u2, wa_raw, wb_raw, block_b=16))
    assert jnp.allclose(out2_bf16, ref2, atol=2e-1, rtol=2e-2), "bf16 mismatch (B=50)"

    print("KERNEL_OK")
</pallas_src>

<mosaic_0001>
module attributes {stable_mosaic.version = 11 : i64} {
  func.func @ssm_kernel(%arg0: i32, %arg1: memref<8x96xf32, #tpu.memory_space<vmem>>, %arg2: memref<8x32xf32, #tpu.memory_space<vmem>>, %arg3: memref<96x32xf32, #tpu.memory_space<vmem>>, %arg4: memref<32x32xf32, #tpu.memory_space<vmem>>, %arg5: memref<8x32xf32, #tpu.memory_space<vmem>>) attributes {dimension_semantics = [#tpu.dimension_semantics<parallel>], iteration_bounds = array<i64: 1>, scalar_prefetch = 0 : i64, scratch_operands = 0 : i64, tpu.core_type = #tpu.core_type<tc>, window_params = [{transform_indices = @transform_0, window_bounds = array<i64: 8, 96>}, {transform_indices = @transform_1, window_bounds = array<i64: 8, 32>}, {pipeline_mode = #tpu.pipeline_mode<synchronous>, transform_indices = @transform_2, window_bounds = array<i64: 96, 32>}, {pipeline_mode = #tpu.pipeline_mode<synchronous>, transform_indices = @transform_3, window_bounds = array<i64: 32, 32>}, {transform_indices = @transform_4, window_bounds = array<i64: 8, 32>}]} {
    %c0 = arith.constant 0 : index
    %c0_0 = arith.constant 0 : index
    %0 = vector.load %arg1[%c0, %c0_0] : memref<8x96xf32, #tpu.memory_space<vmem>>, vector<8x96xf32>
    %c0_1 = arith.constant 0 : index
    %c0_2 = arith.constant 0 : index
    %1 = vector.load %arg3[%c0_1, %c0_2] : memref<96x32xf32, #tpu.memory_space<vmem>>, vector<96x32xf32>
    %cst = arith.constant dense<0.000000e+00> : vector<8x32xf32>
    %2 = tpu.matmul %0, %1, %cst {dimension_numbers = #tpu.dot_dimension_numbers<[1], [0], [0], [1], [0, 0, 1, 1], [], []>} : vector<8x96xf32>, vector<96x32xf32>, vector<8x32xf32> -> vector<8x32xf32>
    %c0_3 = arith.constant 0 : index
    %c0_4 = arith.constant 0 : index
    %3 = vector.load %arg2[%c0_3, %c0_4] : memref<8x32xf32, #tpu.memory_space<vmem>>, vector<8x32xf32>
    %c0_5 = arith.constant 0 : index
    %c0_6 = arith.constant 0 : index
    %4 = vector.load %arg4[%c0_5, %c0_6] : memref<32x32xf32, #tpu.memory_space<vmem>>, vector<32x32xf32>
    %cst_7 = arith.constant dense<0.000000e+00> : vector<8x32xf32>
    %5 = tpu.matmul %3, %4, %cst_7 {dimension_numbers = #tpu.dot_dimension_numbers<[1], [0], [0], [1], [0, 0, 1, 1], [], []>} : vector<8x32xf32>, vector<32x32xf32>, vector<8x32xf32> -> vector<8x32xf32>
    %6 = arith.addf %2, %5 : vector<8x32xf32>
    %c0_8 = arith.constant 0 : index
    %c0_9 = arith.constant 0 : index
    %7 = vector.load %arg5[%c0_8, %c0_9] : memref<8x32xf32, #tpu.memory_space<vmem>>, vector<8x32xf32>
    tpu.vector_store %arg5[%c0_8, %c0_9], %6 {strides = array<i32>} : memref<8x32xf32, #tpu.memory_space<vmem>>, vector<8x32xf32>,
    return
  }
  func.func @transform_0(%arg0: i32) -> (i32, i32) {
    %c0_i32 = arith.constant 0 : i32
    %c0_i32_0 = arith.constant 0 : i32
    return %arg0, %c0_i32 : i32, i32
  }
  func.func @transform_1(%arg0: i32) -> (i32, i32) {
    %c0_i32 = arith.constant 0 : i32
    %c0_i32_0 = arith.constant 0 : i32
    return %arg0, %c0_i32 : i32, i32
  }
  func.func @transform_2(%arg0: i32) -> (i32, i32) {
    %c0_i32 = arith.constant 0 : i32
    %c0_i32_0 = arith.constant 0 : i32
    %c0_i32_1 = arith.constant 0 : i32
    return %c0_i32, %c0_i32_0 : i32, i32
  }
  func.func @transform_3(%arg0: i32) -> (i32, i32) {
    %c0_i32 = arith.constant 0 : i32
    %c0_i32_0 = arith.constant 0 : i32
    %c0_i32_1 = arith.constant 0 : i32
    return %c0_i32, %c0_i32_0 : i32, i32
  }
  func.func @transform_4(%arg0: i32) -> (i32, i32) {
    %c0_i32 = arith.constant 0 : i32
    %c0_i32_0 = arith.constant 0 : i32
    return %arg0, %c0_i32 : i32, i32
  }
}

</mosaic_0001>

<bundles_post_ra>
// kernel: tpu_custom_call.1
= control target key start
LH: loop header
LB: loop body
LE: loop exit
PB: predicated region body
PF: predicated region fallthrough
CT: control target
= control target key end

     0   :  { %s221_s0 = inlined_call_operand.vmem [shape: f32[4,96], index: 0, kind: input, shape index: {}]   ;;  %s222_s1 = inlined_call_operand.vmem [shape: f32[4,32], index: 1, kind: input, shape index: {}]   ;;  %s223_s2 = inlined_call_operand.vmem [shape: f32[96,32], index: 2, kind: input, shape index: {}]   ;;  %s224_s3 = inlined_call_operand.vmem [shape: f32[32,32], index: 3, kind: input, shape index: {}]   ;;  %s225_s4 = inlined_call_operand.hbm [shape: f32[4,32], index: 4, kind: output, shape index: {}]  }
   0x1   :  { %v30_v0 = vld [vmem:[%s223_s2 + $0x58] sm:$0xff]  ;;  %v29_v1 = vld [vmem:[%s223_s2 + $0x50] sm:$0xff]  ;;  %v28_v2 = vld [vmem:[%s223_s2 + $0x48] sm:$0xff] }
   0x2   :  { %68 = vmatpush.msra.mxu1 %v30_v0 }
   0x3   :  { %9 = vsyncpa [#allocation3], 0  ;;  %v35_v3 = vld [vmem:[%s224_s3 + $0x18] sm:$0xff]  ;;  %v34_v4 = vld [vmem:[%s224_s3 + $0x10] sm:$0xff]  ;;  %vm36_vm0 = vcmask 261120   ;;  %vm60_vm1 = vcmask 785408  }
   0x4   :  { %69 = vmatpush.msra.mxu1 %v29_v1  ;;  %v27_v5 = vld [vmem:[%s223_s2 + $0x40] sm:$0xff]  ;;  %52 = vmatpush.msra.mxu0 %v35_v3  ;;  %v33_v6 = vld [vmem:[%s224_s3 + $0x8] sm:$0xff]  ;;  %v26_v7 = vld [vmem:[%s223_s2 + $0x38] sm:$0xff] }
   0x5   :  { %v32_v8 = vld [vmem:[%s224_s3] sm:$0xff]  ;;  %v25_v9 = vld [vmem:[%s223_s2 + $0x30] sm:$0xff]  ;;  %v24_v11 = vld [vmem:[%s223_s2 + $0x28] sm:$0xff] }
   0x6   :  { %70 = vmatpush.msra.mxu1 %v28_v2  ;;  %53 = vmatpush.msra.mxu0 %v34_v4  ;;  %v31_v10 = vld [vmem:[%s222_s1] sm:$0xff]  ;;  %v22_v13 = vld [vmem:[%s223_s2 + $0x18] sm:$0xff]  ;;  %v21_v14 = vld [vmem:[%s223_s2 + $0x10] sm:$0xff] }
   0x7   :  { %v23_v12 = vld [vmem:[%s223_s2 + $0x20] sm:$0xff]  ;;  %v20_v15 = vld [vmem:[%s223_s2 + $0x8] sm:$0xff] }
   0x8   :  { %71 = vmatpush.msra.mxu1 %v27_v5  ;;  %54 = vmatpush.msra.mxu0 %v33_v6  ;;  %v19_v16 = vld [vmem:[%s223_s2] sm:$0xff] }
   0x9   :  { %v18_v17 = vld [vmem:[%s221_s0] sm:$0xff] }
   0xa   :  { %72 = vmatpush.msra.mxu1 %v26_v7  ;;  %55 = vmatpush.msra.mxu0 %v32_v8 }
   0xb   :  { %103 = vmatmul.msk.f32.vlgmr.msra.gmra.mxu0 %vm36_vm0, %v31_v10 }
   0xc   :  { %73 = vmatpush.msra.mxu1 %v25_v9 }
   0xe   :  { %74 = vmatpush.msra.mxu1 %v24_v11 }
  0x10   :  { %75 = vmatpush.msra.mxu1 %v23_v12 }
  0x12   :  { %76 = vmatpush.msra.mxu1 %v22_v13 }
  0x14   :  { %77 = vmatpush.msra.mxu1 %v21_v14 }
  0x16   :  { %78 = vmatpush.msra.mxu1 %v20_v15 }
  0x18   :  { %79 = vmatpush.msra.mxu1 %v19_v16 }
  0x19   :  { %104 = vmatmul.msk.f32.vlgmr.msra.gmra.mxu1 %vm60_vm1, %v18_v17 }
  0x88   :  { %v57_v18 = vpop.f32.mrf.mxu0 }
  0x96   :  { %v81_v19 = vpop.f32.mrf.mxu1 }
  0x97   :  { %v82_v20 = vadd.f32 %v81_v19, %v57_v18 }
  0x99   :  { %84 = vst.msk [vmem:[#allocation2] sm:$0xff] %vm36_vm0, %v82_v20 }
  0x9a   :  { %88 = vsyncadd [#allocation3], 64  ;;  %s91_s25 = sshll.u32 %s225_s4, 4  ;;  %s134_s26 = smov [#allocation2]   ;;  %s92_s25 = int_to_ptr.hbm [resolvable:$true] %s91_s25 }
  0x9b   :  { %s89_s2 = sshll.u32 %s134_s26, 4  ;;  %s135_s27 = smov 64   ;;  %s90_s2 = int_to_ptr.vmem [resolvable:$true] %s89_s2 }
  0x9c   :  { %s136_s28 = smov 4  }
  0x9d   :  { %97 = dma.vmem_to_hbm [thread:$0]  %s90_s2, 64, %s92_s25, [#allocation3], %s135_s27, %s135_s27, %s136_s28  }
  0x9e   :  { %132 = dma.done.wait [#allocation3], 128  }
  0x9f   :  { %133 = vsyncadd [#allocation3], 4294967168 }
  0xa0   :  { %102 = vsyncpa [#allocation3], 1 }

</bundles_post_ra>
